<compile_context>
chip_gen: v7x
topology: tpu7x:2x2x1
jax: 0.10.0
libtpu: 0.0.40
codegen_flags: <defaults>
</compile_context>

<pallas_src>
import jax
import jax.numpy as jnp
from jax.experimental import pallas as pl
from jax.experimental.pallas import tpu as pltpu


def fullconv_kernel(x_ref, scale_ref, shift_ref, w_ref, b_ref, o_ref):
    # x_ref:     (C, T)     tile of pixels, channels on sublanes, pixels on lanes
    # scale_ref: (C, 1)     folded BN scale = gamma / sqrt(var + eps)
    # shift_ref: (C, 1)     folded BN shift = beta - mean * scale
    # w_ref:     (Cout, C)  1x1 conv weight (native layout)
    # b_ref:     (Cout, 1)  conv bias
    # o_ref:     (Cout, T)
    x = x_ref[...].astype(jnp.float32)
    y = x * scale_ref[...] + shift_ref[...]            # BatchNorm (eval mode)
    y = jnp.maximum(y, 0.0)                            # ReLU
    out = jnp.dot(w_ref[...], y.astype(w_ref.dtype),   # (Cout, C) @ (C, T)
                  preferred_element_type=jnp.float32)
    out = out + b_ref[...]
    o_ref[...] = out.astype(o_ref.dtype)


def _round_up(x, m):
    return (x + m - 1) // m * m


def fullconv_pallas(x_nchw, gamma, beta, run_mean, run_var, conv_w, conv_b,
                    *, eps=1e-5, max_tile_hw=2048):
    N, C, H, W = x_nchw.shape
    Cout = conv_w.shape[0]
    HW = H * W

    # Fold BN (eval mode) into a per-channel affine.
    scale = (gamma.astype(jnp.float32)
             / jnp.sqrt(run_var.astype(jnp.float32) + eps))             # (C,)
    shift = beta.astype(jnp.float32) - run_mean.astype(jnp.float32) * scale

    # NCHW already has the layout we want: (N, C, H*W).  Reshape only.
    x3d = x_nchw.reshape(N, C, HW)

    # Lane-dense spatial tiling (multiple of 128); pad spatial axis if needed.
    if HW <= max_tile_hw:
        tile_hw = _round_up(HW, 128)
    else:
        tile_hw = max_tile_hw                          # already a 128-multiple
    hw_pad = _round_up(HW, tile_hw)
    if hw_pad != HW:
        x3d = jnp.pad(x3d, ((0, 0), (0, 0), (0, hw_pad - HW)))

    w2d = conv_w.reshape(Cout, C)                      # native dtype, no transpose
    b2d = conv_b.reshape(Cout, 1).astype(jnp.float32)
    scale2d = scale.reshape(C, 1)
    shift2d = shift.reshape(C, 1)

    grid = (N, hw_pad // tile_hw)

    out3d = pl.pallas_call(
        fullconv_kernel,
        out_shape=jax.ShapeDtypeStruct((N, Cout, hw_pad), x_nchw.dtype),
        grid_spec=pltpu.PrefetchScalarGridSpec(
            num_scalar_prefetch=0,
            grid=grid,
            in_specs=[
                pl.BlockSpec((pl.Squeezed(), C, tile_hw),
                             lambda n, t: (n, 0, t)),
                pl.BlockSpec((C, 1), lambda n, t: (0, 0)),
                pl.BlockSpec((C, 1), lambda n, t: (0, 0)),
                pl.BlockSpec((Cout, C), lambda n, t: (0, 0)),
                pl.BlockSpec((Cout, 1), lambda n, t: (0, 0)),
            ],
            out_specs=pl.BlockSpec((pl.Squeezed(), Cout, tile_hw),
                                   lambda n, t: (n, 0, t)),
        ),
        compiler_params=pltpu.CompilerParams(
            dimension_semantics=("parallel", "parallel")),
    )(x3d, scale2d, shift2d, w2d, b2d)

    if hw_pad != HW:
        out3d = out3d[:, :, :HW]
    return out3d.reshape(N, Cout, H, W)


def fullconv_ref(x_nchw, gamma, beta, run_mean, run_var, conv_w, conv_b,
                 *, eps=1e-5):
    scale = gamma / jnp.sqrt(run_var + eps)
    shift = beta - run_mean * scale
    y = x_nchw * scale[None, :, None, None] + shift[None, :, None, None]
    y = jnp.maximum(y, 0.0)
    # 1x1 conv == per-pixel channel matmul
    out = jnp.einsum("nchw,oc->nohw", y, conv_w.reshape(conv_w.shape[0], -1))
    return out + conv_b[None, :, None, None]


if __name__ == "__main__":
    N, C, H, W = 2, 32, 16, 16     # in_dims = 32
    Cout = 8                       # last_channels = 8

    key = jax.random.PRNGKey(0)
    k1, k2, k3, k4, k5, k6 = jax.random.split(key, 6)

    x = jax.random.normal(k1, (N, C, H, W), dtype=jnp.float32)

    # BatchNorm2d parameters (synthetic, non-trivial so the BN path is tested).
    gamma = 1.0 + 0.1 * jax.random.normal(k2, (C,), dtype=jnp.float32)
    beta = 0.1 * jax.random.normal(k3, (C,), dtype=jnp.float32)
    run_mean = 0.1 * jax.random.normal(k4, (C,), dtype=jnp.float32)
    run_var = jnp.abs(1.0 + 0.1 * jax.random.normal(k5, (C,), dtype=jnp.float32))

    # Conv2d(in_dims, last_channels, 1): weight (Cout, C, 1, 1), bias (Cout,)
    conv_w = (jax.random.normal(k6, (Cout, C, 1, 1), dtype=jnp.float32)
              / jnp.sqrt(C))
    conv_b = 0.05 * jnp.arange(Cout, dtype=jnp.float32)

    out = fullconv_pallas(x, gamma, beta, run_mean, run_var, conv_w, conv_b)
    out = jax.block_until_ready(out)

    ref = fullconv_ref(x, gamma, beta, run_mean, run_var, conv_w, conv_b)
    assert out.shape == (N, Cout, H, W)
    assert jnp.allclose(out, ref, atol=1e-4, rtol=1e-4), "mismatch vs reference"

    print("KERNEL_OK")
</pallas_src>

<mosaic_0001>
module attributes {stable_mosaic.version = 11 : i64} {
  func.func @fullconv_kernel(%arg0: i32, %arg1: i32, %arg2: memref<1x32x256xf32, #tpu.memory_space<vmem>>, %arg3: memref<32x1xf32, #tpu.memory_space<vmem>>, %arg4: memref<32x1xf32, #tpu.memory_space<vmem>>, %arg5: memref<8x32xf32, #tpu.memory_space<vmem>>, %arg6: memref<8x1xf32, #tpu.memory_space<vmem>>, %arg7: memref<1x8x256xf32, #tpu.memory_space<vmem>>) attributes {dimension_semantics = [#tpu.dimension_semantics<parallel>, #tpu.dimension_semantics<parallel>], iteration_bounds = array<i64: 2, 1>, scalar_prefetch = 0 : i64, scratch_operands = 0 : i64, tpu.core_type = #tpu.core_type<tc>, window_params = [{transform_indices = @transform_0, window_bounds = array<i64: 1, 32, 256>}, {pipeline_mode = #tpu.pipeline_mode<synchronous>, transform_indices = @transform_1, window_bounds = array<i64: 32, 1>}, {pipeline_mode = #tpu.pipeline_mode<synchronous>, transform_indices = @transform_2, window_bounds = array<i64: 32, 1>}, {pipeline_mode = #tpu.pipeline_mode<synchronous>, transform_indices = @transform_3, window_bounds = array<i64: 8, 32>}, {pipeline_mode = #tpu.pipeline_mode<synchronous>, transform_indices = @transform_4, window_bounds = array<i64: 8, 1>}, {transform_indices = @transform_5, window_bounds = array<i64: 1, 8, 256>}]} {
    %c0 = arith.constant 0 : index
    %c0_0 = arith.constant 0 : index
    %c0_1 = arith.constant 0 : index
    %0 = vector.load %arg2[%c0, %c0_0, %c0_1] : memref<1x32x256xf32, #tpu.memory_space<vmem>>, vector<1x32x256xf32>
    %1 = vector.shape_cast %0 : vector<1x32x256xf32> to vector<32x256xf32>
    %c0_2 = arith.constant 0 : index
    %c0_3 = arith.constant 0 : index
    %2 = vector.load %arg3[%c0_2, %c0_3] : memref<32x1xf32, #tpu.memory_space<vmem>>, vector<32x1xf32>
    %3 = vector.broadcast %2 : vector<32x1xf32> to vector<32x256xf32>
    %4 = arith.mulf %1, %3 : vector<32x256xf32>
    %c0_4 = arith.constant 0 : index
    %c0_5 = arith.constant 0 : index
    %5 = vector.load %arg4[%c0_4, %c0_5] : memref<32x1xf32, #tpu.memory_space<vmem>>, vector<32x1xf32>
    %6 = vector.broadcast %5 : vector<32x1xf32> to vector<32x256xf32>
    %7 = arith.addf %4, %6 : vector<32x256xf32>
    %cst = arith.constant 0.000000e+00 : f32
    %8 = vector.broadcast %cst : f32 to vector<32x256xf32>
    %9 = arith.maximumf %7, %8 : vector<32x256xf32>
    %c0_6 = arith.constant 0 : index
    %c0_7 = arith.constant 0 : index
    %10 = vector.load %arg5[%c0_6, %c0_7] : memref<8x32xf32, #tpu.memory_space<vmem>>, vector<8x32xf32>
    %cst_8 = arith.constant dense<0.000000e+00> : vector<8x256xf32>
    %11 = tpu.matmul %10, %9, %cst_8 {dimension_numbers = #tpu.dot_dimension_numbers<[1], [0], [0], [1], [0, 0, 1, 1], [], []>} : vector<8x32xf32>, vector<32x256xf32>, vector<8x256xf32> -> vector<8x256xf32>
    %c0_9 = arith.constant 0 : index
    %c0_10 = arith.constant 0 : index
    %12 = vector.load %arg6[%c0_9, %c0_10] : memref<8x1xf32, #tpu.memory_space<vmem>>, vector<8x1xf32>
    %13 = vector.broadcast %12 : vector<8x1xf32> to vector<8x256xf32>
    %14 = arith.addf %11, %13 : vector<8x256xf32>
    %c0_11 = arith.constant 0 : index
    %c0_12 = arith.constant 0 : index
    %c0_13 = arith.constant 0 : index
    %15 = vector.load %arg7[%c0_11, %c0_12, %c0_13] : memref<1x8x256xf32, #tpu.memory_space<vmem>>, vector<1x8x256xf32>
    %16 = vector.shape_cast %15 : vector<1x8x256xf32> to vector<8x256xf32>
    %17 = vector.shape_cast %14 : vector<8x256xf32> to vector<1x8x256xf32>
    tpu.vector_store %arg7[%c0_11, %c0_12, %c0_13], %17 {strides = array<i32>} : memref<1x8x256xf32, #tpu.memory_space<vmem>>, vector<1x8x256xf32>,
    return
  }
  func.func @transform_0(%arg0: i32, %arg1: i32) -> (i32, i32, i32) {
    %c0_i32 = arith.constant 0 : i32
    %c0_i32_0 = arith.constant 0 : i32
    return %arg0, %c0_i32, %arg1 : i32, i32, i32
  }
  func.func @transform_1(%arg0: i32, %arg1: i32) -> (i32, i32) {
    %c0_i32 = arith.constant 0 : i32
    %c0_i32_0 = arith.constant 0 : i32
    %c0_i32_1 = arith.constant 0 : i32
    return %c0_i32, %c0_i32_0 : i32, i32
  }
  func.func @transform_2(%arg0: i32, %arg1: i32) -> (i32, i32) {
    %c0_i32 = arith.constant 0 : i32
    %c0_i32_0 = arith.constant 0 : i32
    %c0_i32_1 = arith.constant 0 : i32
    return %c0_i32, %c0_i32_0 : i32, i32
  }
  func.func @transform_3(%arg0: i32, %arg1: i32) -> (i32, i32) {
    %c0_i32 = arith.constant 0 : i32
    %c0_i32_0 = arith.constant 0 : i32
    %c0_i32_1 = arith.constant 0 : i32
    return %c0_i32, %c0_i32_0 : i32, i32
  }
  func.func @transform_4(%arg0: i32, %arg1: i32) -> (i32, i32) {
    %c0_i32 = arith.constant 0 : i32
    %c0_i32_0 = arith.constant 0 : i32
    %c0_i32_1 = arith.constant 0 : i32
    return %c0_i32, %c0_i32_0 : i32, i32
  }
  func.func @transform_5(%arg0: i32, %arg1: i32) -> (i32, i32, i32) {
    %c0_i32 = arith.constant 0 : i32
    %c0_i32_0 = arith.constant 0 : i32
    return %arg0, %c0_i32, %arg1 : i32, i32, i32
  }
}

</mosaic_0001>

<bundles_post_ra>
// kernel: tpu_custom_call.1
= control target key start
LH: loop header
LB: loop body
LE: loop exit
PB: predicated region body
PF: predicated region fallthrough
CT: control target
= control target key end

     0   :  { %10 = vsyncpa [#allocation3], 0  ;;  %s986_s0 = inlined_call_operand.hbm [shape: f32[2,32,256], index: 0, kind: input, shape index: {}]   ;;  %s987_s1 = inlined_call_operand.vmem [shape: f32[32,1], index: 1, kind: input, shape index: {}]   ;;  %s988_s2 = inlined_call_operand.vmem [shape: f32[32,1], index: 2, kind: input, shape index: {}]   ;;  %s989_s3 = inlined_call_operand.vmem [shape: f32[8,32], index: 3, kind: input, shape index: {}]   ;;  %s990_s4 = inlined_call_operand.vmem [shape: f32[8,1], index: 4, kind: input, shape index: {}]   ;;  %s991_s5 = inlined_call_operand.hbm [shape: f32[2,8,256], index: 5, kind: output, shape index: {}]  }
   0x1   :  { %12 = vsyncpa [#allocation3 + $0x1], 0 }
   0x2   :  { %13 = vsyncpa [#allocation4], 0 }
   0x3   :  { %15 = vsyncpa [#allocation4 + $0x1], 0  ;;  %s772_s18 = smov 0   ;;  %s774_s19 = smov 0  }
   0x4   :  { %s776_s20 = smov 0   ;;  %s778_s21 = smov 0  }
   0x5   :  { %s780_s22 = smov 0   ;;  %s782_s23 = smov 0  }
   0x6 LB: > { %s528_s24 = sadd.s32 4294967295, %s734_s23   ;;  %s529_s25 = sadd.s32 4294967294, %s734_s23   ;;  %s734_s23 = sphi %s782_s23, %s21_s23   ;;  %s730_s22 = sphi %s780_s22, %s1006_s22   ;;  %s726_s21 = sphi %s778_s21, %s1005_s21   ;;  %s722_s20 = sphi %s776_s20, %s1004_s20   ;;  %s718_s19 = sphi %s774_s19, %s1003_s19   ;;  %s714_s18 = sphi %s772_s18, %s1002_s18  }
   0x7   : > { %s33_s26 = sadd.s32 1, %s730_s22  ;;  %s42_s27 = sadd.s32 1, %s722_s20 }
   0x8   : > { %p35_p0 = scmp.ge.s32.totalorder %s33_s26, 2  ;;  %p49_p1 = scmp.ne.s32.totalorder %s722_s20, %s718_s19 }
   0x9   : > { %p50_p2 = scmp.eq.s32.totalorder %s734_s23, 0  ;;  %p55_p3 = scmp.ne.s32.totalorder %s718_s19, %s714_s18 }
   0xa   : > { %s1008_s26 = smov (%p35_p0, %s33_s26), 0  ;;  %p56_p5 = scmp.eq.s32.totalorder %s528_s24, 0 }
   0xb   : > { %p813_p4 = por %p50_p2, %p49_p1  ;;  %s37_s29 = ssub.s32 %s730_s22, %s1008_s26 }
   0xc   : > { %p165_p6 = scmp.eq.s32.totalorder %s528_s24, 1  ;;  %p40_p7 = scmp.eq.s32.totalorder %s37_s29, 0 }
   0xd   : > { %p819_p8 = por %p56_p5, %p55_p3  ;;  %p171_p10 = scmp.eq.s32.totalorder %s529_s25, 1 }
   0xe   : > { %p823_p9 = por %p165_p6, %p49_p1  ;;  %p566_p13 = scmp.lt.s32.totalorder %s734_s23, 2 }
   0xf   : > { %s828_s7 = scalar_select %p40_p7, %s722_s20, %s42_s27  }
  0x10   : > { %s995_s6 = scalar_select %p823_p9, 1, 0 }
  0x11   : > { %p830_p11 = por %p171_p10, %p55_p3  ;;  %s203_s9 = sand.u32 1, %s722_s20  }
  0x12   : > { %s532_s10 = sshll.u32 %s203_s9, 6  ;;  %s544_s11 = sshll.u32 %s730_s22, 10 }
  0x13   : > { %s996_s8 = scalar_select %p830_p11, 1, 0 }
  0x14   : > { %s841_s14 = scalar_lea.hbm %s986_s0, %s544_s11  ;;  %s207_s15 = scalar_lea.vmem [#allocation2], %s532_s10 }
  0x15   : > { %s216_s16 = sshll.u32 %s207_s15, 4  ;;  %p847_p0 = pnand %p566_p13, %p813_p4  ;;  %s843_s16 = int_to_ptr.vmem [resolvable:$true] %s216_s16 }
  0x16   : > { %s852_s24 = scalar_lea.sflag [#allocation3], %s203_s9  ;;  %s622_s25 = scalar_lea.hbm %s841_s14, 1024 }
  0x17   : > { %p623_p2 = scmp.ne.s32.totalorder %s841_s14, %s622_s25  ;;  %p624_p3 = pneg %p847_p0 }
  0x18   : > { %s627_s28 = scalar_lea.hbm %s986_s0, 2048  ;;  %p628_p4 = scmp.lt.u32.totalorder %s841_s14, %s986_s0 }
  0x19   : > { %p625_p5 = pnand %p624_p3, %p623_p2  ;;  %p629_p7 = scmp.lt.u32.totalorder %s627_s28, %s622_s25 }
  0x1a   : > { %p631_p13 = scmp.lt.u32.totalorder %s622_s25, %s841_s14 }
  0x1b   : > { %p626_p6 = pneg %p625_p5  ;;  %p630_p10 = por %p629_p7, %p628_p4 }
  0x1d   : > { %p632_p12 = por %p631_p13, %p630_p10 }
  0x1f   : > { %p633_p1 = pnand %p632_p12, %p626_p6 }
  0x21   : > { %636 = shalt.err (!%p633_p1)
}
  0x22   : > { %s637_s9 = scalar_lea.vmem %s843_s16, 1024  ;;  %s736_s12 = smov [#allocation2]  }
  0x23   : > { %p638_p2 = scmp.ne.s32.totalorder %s843_s16, %s637_s9  ;;  %s642_s13 = sshll.u32 %s736_s12, 4  ;;  %s643_s13 = int_to_ptr.vmem [resolvable:$false] %s642_s13 }
  0x24   : > { %s644_s15 = scalar_lea.vmem %s643_s13, 2048  ;;  %p645_p9 = scmp.lt.s32.totalorder %s843_s16, %s643_s13 }
  0x25   : > { %p640_p5 = pnand %p638_p2, %p624_p3  ;;  %p646_p4 = scmp.lt.s32.totalorder %s644_s15, %s637_s9 }
  0x27   : > { %p641_p11 = pneg %p640_p5  ;;  %p647_p7 = por %p646_p4, %p645_p9 }
  0x29   : > { %p648_p10 = pnand %p647_p7, %p641_p11 }
  0x2b   : > { %651 = shalt.err (!%p648_p10)
}
  0x2c   : > { %s737_s25 = smov 256   ;;  %s738_s27 = smov 16  }
  0x2d   : > { %561 = dma.hbm_to_vmem [thread:$0]  (!%p847_p0), %s841_s14, 1024, %s843_s16, %s852_s24, %s737_s25, %s737_s25, %s738_s27  }
  0x2e   : > { %p224_p12 = scmp.lt.s32.totalorder %s734_s23, 3  ;;  %p998_p1 = scmp.ge.s32.totalorder %s734_s23, 1 }
  0x30   : > { %p225_p3 = pnand %p998_p1, %p224_p12 }
  0x31   : > { %s884_s29 = sand.u32 (!%p225_p3), 1, %s718_s19  }
  0x32   : > { %228 = sbr.rel (%p225_p3) target bundleno = 439 (0x1b7), region = 40  ;;  %s536_s28 = sshll.u32 (!%p225_p3), %s884_s29, 6 }
  0x33   : > { %s231_s10 = scalar_lea.sflag (!%p225_p3), [#allocation3], %s884_s29  ;;  %s888_s11 = scalar_lea.vmem (!%p225_p3), [#allocation2], %s536_s28 }
  0x39   : > { %705 = dma.done.wait (%p819_p8), %s231_s10, 1024  }
  0x3a   : > { %707 = vsyncadd (%p819_p8), %s231_s10, 4294966272  ;;  %v739_v0 = vmov 0   ;;  %v303_v1 = vld [vmem:[%s988_s2] sm:$0xff]  ;;  %v304_v3 = vld [vmem:[%s988_s2 + $0x8] sm:$0xff]  ;;  %v740_v10 = vmov 0.0   ;;  %vm350_vm0 = vcmask 261120  }
  0x3b   : > { %621 = vset.pattern.permute.xlu1 %v739_v0  ;;  %620 = vset.pattern.permute.xlu0 %v739_v0  ;;  %v271_v2 = vld [vmem:[%s987_s1] sm:$0xff]  ;;  %v272_v4 = vld [vmem:[%s987_s1 + $0x8] sm:$0xff]  ;;  %v274_v5 = vld [vmem:[%s987_s1 + $0x18] sm:$0xff]  ;;  %s537_s13 = sshll.u32 %s884_s29, 4  ;;  %s545_s30 = sshll.u32 %s726_s21, 8 }
  0x3c   : > { %309 = vperm.xlu1 %621, %v303_v1   ;;  %277 = vperm.xlu0 %620, %v271_v2   ;;  %v273_v6 = vld [vmem:[%s987_s1 + $0x10] sm:$0xff]  ;;  %v306_v7 = vld [vmem:[%s988_s2 + $0x18] sm:$0xff]  ;;  %v344_v9 = vld [vmem:[%s990_s4] sm:$0xff]  ;;  %s260_s15 = scalar_lea.vmem [#allocation5], %s537_s13  ;;  %s937_s10 = scalar_lea.hbm %s991_s5, %s545_s30 }
  0x3d   : > { %v305_v8 = vld [vmem:[%s988_s2 + $0x10] sm:$0xff]  ;;  %418 = vmatprep.mubr.f32.mxu0 %v740_v10  ;;  %v263_v11 = vld [vmem:[%s888_s11] sm:$0xff]  ;;  %v264_v12 = vld [vmem:[%s888_s11 + $0x8] sm:$0xff]  ;;  %s444_s25 = sshll.u32 %s260_s15, 4  ;;  %s428_s21 = scalar_lea.sflag [#allocation4], %s884_s29  ;;  %s939_s25 = int_to_ptr.vmem [resolvable:$true] %s444_s25 }
  0x3e   : > { %v265_v17 = vld [vmem:[%s888_s11 + $0x10] sm:$0xff]  ;;  %v266_v18 = vld [vmem:[%s888_s11 + $0x18] sm:$0xff]  ;;  %v267_v31 = vld [vmem:[%s888_s11 + $0x20] sm:$0xff]  ;;  %s652_s14 = scalar_lea.vmem %s939_s25, 256  ;;  %p999_p9 = scmp.ne.s32.totalorder %s995_s6, 0 }
  0x3f   : > { %v269_v26 = vld [vmem:[%s888_s11 + $0x30] sm:$0xff]  ;;  %v270_v29 = vld [vmem:[%s888_s11 + $0x38] sm:$0xff]  ;;  %v268_v32 = vld [vmem:[%s888_s11 + $0x28] sm:$0xff]  ;;  %p653_p8 = scmp.ne.s32.totalorder %s939_s25, %s652_s14  ;;  %s741_s16 = smov [#allocation5]  }
  0x40   : > { %314 = vperm.xlu1 %621, %v304_v3   ;;  %282 = vperm.xlu0 %620, %v272_v4   ;;  %v343_v55 = vld [vmem:[%s989_s3] sm:$0xff]  ;;  %s656_s17 = sshll.u32 %s741_s16, 4  ;;  %s657_s17 = int_to_ptr.vmem [resolvable:$false] %s656_s17 }
  0x41   : > { %p654_p11 = pnand %p653_p8, %p999_p9  ;;  %s658_s24 = scalar_lea.vmem %s657_s17, 512 }
  0x42   : > { %p659_p6 = scmp.lt.s32.totalorder %s939_s25, %s657_s17  ;;  %p660_p13 = scmp.lt.s32.totalorder %s658_s24, %s652_s14 }
  0x43   : > { %p655_p0 = pneg %p654_p11 }
  0x44   : > { %292 = vperm.xlu1 %621, %v274_v5   ;;  %287 = vperm.xlu0 %620, %v273_v6   ;;  %p661_p2 = por %p660_p13, %p659_p6 }
  0x46   : > { %p662_p5 = pnand %p661_p2, %p655_p0 }
  0x48   : > { %324 = vperm.xlu1 %621, %v306_v7   ;;  %319 = vperm.xlu0 %620, %v305_v8  }
  0x4c   : > { %347 = vperm.xlu0 %620, %v344_v9  }
  0xbb   : > { %v310_v13 = vpop.permute.xlu1 %309  ;;  %v278_v14 = vpop.permute.xlu0 %277 }
  0xbc   : > { %v295_v15 = vmul.f32 %v278_v14, %v263_v11  ;;  %v296_v16 = vmul.f32 %v278_v14, %v264_v12 }
  0xbe   : > { %v327_v23 = vadd.f32 %v310_v13, %v295_v15  ;;  %v328_v24 = vadd.f32 %v310_v13, %v296_v16 }
  0xbf   : > { %v315_v19 = vpop.permute.xlu1 %314  ;;  %v283_v20 = vpop.permute.xlu0 %282 }
  0xc0   : > { %v297_v21 = vmul.f32 %v283_v20, %v265_v17  ;;  %v298_v22 = vmul.f32 %v283_v20, %v266_v18  ;;  %v336_v33 = vmax.f32 %v328_v24, 0.0  ;;  %v335_v35 = vmax.f32 %v327_v23, 0.0 }
  0xc2   : > { %v329_v25 = vadd.f32 %v315_v19, %v297_v21  ;;  %v330_v27 = vadd.f32 %v315_v19, %v298_v22 }
  0xc3   : > { %v293_v28 = vpop.permute.xlu1 %292  ;;  %v288_v30 = vpop.permute.xlu0 %287 }
  0xc4   : > { %v338_v34 = vmax.f32 %v330_v27, 0.0  ;;  %v337_v36 = vmax.f32 %v329_v25, 0.0  ;;  %v301_v37 = vmul.f32 %v293_v28, %v269_v26  ;;  %v302_v38 = vmul.f32 %v293_v28, %v270_v29 }
  0xc5   : > { %v299_v39 = vmul.f32 %v288_v30, %v267_v31  ;;  %v300_v40 = vmul.f32 %v288_v30, %v268_v32 }
  0xc6   : > { %v546_v43 = vpack.c.bf16 %v338_v34, %v336_v33  ;;  %v548_v44 = vpack.c.bf16 %v337_v36, %v335_v35 }
  0xc7   : > { %v325_v41 = vpop.permute.xlu1 %324  ;;  %v320_v42 = vpop.permute.xlu0 %319 }
  0xc8   : > { %v333_v45 = vadd.f32 %v325_v41, %v301_v37  ;;  %v334_v46 = vadd.f32 %v325_v41, %v302_v38  ;;  %v331_v47 = vadd.f32 %v320_v42, %v299_v39  ;;  %v332_v48 = vadd.f32 %v320_v42, %v300_v40  ;;  %547 = vmatprep.subr.bf16.mxu0 %v546_v43 }
  0xc9   : > { %549 = vmatpush1.bf16.msra.mxu0 %v548_v44 }
  0xca   : > { %v341_v49 = vmax.f32 %v333_v45, 0.0  ;;  %v342_v50 = vmax.f32 %v334_v46, 0.0  ;;  %v339_v51 = vmax.f32 %v331_v47, 0.0  ;;  %v340_v52 = vmax.f32 %v332_v48, 0.0 }
  0xcb   : > { %v348_v56 = vpop.permute.xlu0 %347 }
  0xcc   : > { %v550_v53 = vpack.c.bf16 %v342_v50, %v340_v52  ;;  %v552_v54 = vpack.c.bf16 %v341_v49, %v339_v51 }
  0xce   : > { %551 = vmatprep.subr.bf16.mxu0 %v550_v53 }
  0xcf   : > { %553 = vmatpush1.bf16.msra.mxu0 %v552_v54 }
  0xd2   : > { %538 = vmatmul.mubr.msk.f32.vlgmr.msra.gmra.mrb[0].mxu0 %vm350_vm0, %v343_v55 }
 0x1a5   : > { %v420_v57 = vpop.f32.mrb[0].mxu0 }
 0x1a6   : > { %v421_v58 = vadd.f32 %v420_v57, %v348_v56  ;;  %v422_v59 = vpop.f32.mrb[1].mxu0 }
 0x1a7   : > { %v423_v60 = vadd.f32 %v422_v59, %v348_v56 }
 0x1a8   : > { %425 = vst [vmem:[%s260_s15] sm:$0xff] %v421_v58 }
 0x1a9   : > { %426 = vst [vmem:[%s260_s15 + $0x8] sm:$0xff] %v423_v60 }
 0x1aa   : > { %665 = shalt.err (!%p662_p5)
}
 0x1ab   : > { %s666_s29 = scalar_lea.hbm %s937_s10, 256  ;;  %s670_s12 = scalar_lea.hbm %s991_s5, 512 }
 0x1ac   : > { %p667_p4 = scmp.ne.s32.totalorder %s937_s10, %s666_s29  ;;  %p671_p12 = scmp.lt.u32.totalorder %s937_s10, %s991_s5 }
 0x1ad   : > { %p672_p1 = scmp.lt.u32.totalorder %s670_s12, %s666_s29  ;;  %p674_p8 = scmp.lt.u32.totalorder %s666_s29, %s937_s10 }
 0x1ae   : > { %p668_p7 = pnand %p667_p4, %p999_p9 }
 0x1af   : > { %p673_p3 = por %p672_p1, %p671_p12 }
 0x1b0   : > { %p669_p10 = pneg %p668_p7 }
 0x1b1   : > { %p675_p11 = por %p674_p8, %p673_p3 }
 0x1b3   : > { %p676_p0 = pnand %p675_p11, %p669_p10 }
 0x1b5   : > { %679 = shalt.err (!%p676_p0)
}
 0x1b6   : > { %556 = dma.vmem_to_hbm [thread:$0]  (%p999_p9), %s939_s25, 256, %s937_s10, %s428_s21  }
 0x1b7 PF: > { %s456_s15 = sand.u32 1, %s714_s18   ;;  %p1000_p6 = scmp.ne.s32.totalorder %s996_s8, 0 }
 0x1b8   : > { %p1001_p13 = scmp.ge.s32.totalorder %s734_s23, 2  ;;  %s457_s27 = scalar_lea.sflag [#allocation4], %s456_s15 }
 0x1ba   : > { %p563_p2 = pnand %p1001_p13, %p1000_p6 }
 0x1bc   : > { %709 = dma.done.wait (!%p563_p2), %s457_s27, 256  }
 0x1bd   : > { %711 = vsyncadd (!%p563_p2), %s457_s27, 4294967040  ;;  %s21_s23 = sadd.s32 1, %s734_s23   ;;  %s1002_s18 = smov %s718_s19 }
 0x1be   : > { %p18_p5 = scmp.ge.s32.totalorder %s21_s23, 4   ;;  %s1003_s19 = smov %s722_s20 }
 0x1bf   : > { %s1004_s20 = smov %s828_s7  ;;  %s1005_s21 = smov %s730_s22 }
 0x1c0   : > { %s1006_s22 = smov %s1008_s26  ;;  %20 = sbr.rel (!%p18_p5) target bundleno = 6 (0x6), region = 85 }
 0x1c7   :  { %462 = vsyncpa [#allocation3], 1 }
 0x1c8   :  { %464 = vsyncpa [#allocation3 + $0x1], 1 }
 0x1c9   :  { %465 = vsyncpa [#allocation4], 1 }
 0x1ca   :  { %467 = vsyncpa [#allocation4 + $0x1], 1 }

</bundles_post_ra>
